<compile_context>
chip_gen: v6e
topology: v6e:2x2x1
jax: 0.10.0
libtpu: 0.0.40
codegen_flags: <defaults>
</compile_context>

<pallas_src>
import functools

import jax
import jax.numpy as jnp
from jax.experimental import pallas as pl
from jax.experimental.pallas import tpu as pltpu

_LANE = 128


def _round_up(x, m):
    return ((x + m - 1) // m) * m


def _mlp_kernel(x_ref, w1_ref, b1_ref, w2_ref, b2_ref, o_ref):
    """Fused 2-layer MLP forward for one batch tile.

    x_ref : (TB, D)    input tile (f32 or bf16), feature dim unpadded
    w1_ref: (D, Hp)    first Linear weight (in, out), hidden lane-padded to 128
    b1_ref: (1, Hp)    first Linear bias (f32)
    w2_ref: (Hp, O)    second Linear weight (in, out), output dim unpadded
    b2_ref: (1, O)     second Linear bias (f32)
    o_ref : (TB, O)    output logits tile (f32)
    """
    x = x_ref[...]
    # Hidden layer: MXU matmul with f32 accumulation, f32 bias + ReLU epilogue.
    h = jnp.dot(x, w1_ref[...], preferred_element_type=jnp.float32) + b1_ref[...]
    h = jnp.maximum(h, 0.0)
    # Output layer: logits, no activation (matches nn.Sequential). Output dim is
    # unpadded (O=1 typically); the MXU is idle here so the narrow N is free, and
    # the store is only O lanes wide.
    h = h.astype(w2_ref.dtype)
    o = jnp.dot(h, w2_ref[...], preferred_element_type=jnp.float32) + b2_ref[...]
    o_ref[...] = o.astype(o_ref.dtype)


@functools.partial(jax.jit, static_argnames=("block_b", "use_bf16"))
def mlp_forward(x, w1, b1, w2, b2, *, block_b=None, use_bf16=False):
    """Fused MLP forward as a single pallas_call.

    x : (N, D) float32
    w1: (D, H), b1: (1, H) or (H,)
    w2: (H, O), b2: (1, O) or (O,)
    returns: (N, O) float32 logits
    """
    n, d = x.shape
    h_dim = w1.shape[1]
    o_dim = w2.shape[1]

    # Only the hidden axis (both matmuls touch it on the lane side of W1 / sublane
    # side of W2) gets lane padding; D and O stay at their real widths in HBM.
    h_pad = _round_up(h_dim, _LANE)

    # Batch tile: sublane-aligned (16 for bf16 packing, 8 for f32), chosen so the
    # grid has >=4 steps for large batches (>=2 per TensorCore on v7x), capped at
    # 2048 rows to amortize the ~0.35us per-grid-step overhead.
    sublane = 16 if use_bf16 else 8
    if block_b is None:
        target = -(-n // 4)  # cdiv(n, 4)
        block_b = min(_round_up(max(target, sublane), sublane), 2048)
    block_b = max(sublane, _round_up(block_b, sublane))
    n_pad = _round_up(n, block_b)

    # Zero-pad: batch rows up to a block multiple; hidden columns of W1/b1 and
    # hidden rows of W2 up to h_pad (zeros => numerics of real columns are exact).
    xp = x if n_pad == n else jnp.pad(x, ((0, n_pad - n), (0, 0)))
    w1p = jnp.pad(w1, ((0, 0), (0, h_pad - h_dim)))
    b1p = jnp.pad(b1.reshape(1, -1), ((0, 0), (0, h_pad - h_dim))).astype(jnp.float32)
    w2p = jnp.pad(w2, ((0, h_pad - h_dim), (0, 0)))
    b2p = b2.reshape(1, -1).astype(jnp.float32)

    if use_bf16:
        # Cast matmul operands; with allow_input_fusion on x the pad+cast can fuse
        # into the pallas_call input rather than materializing an extra HBM pass.
        xp = xp.astype(jnp.bfloat16)
        w1p = w1p.astype(jnp.bfloat16)
        w2p = w2p.astype(jnp.bfloat16)

    # VMEM budget from the actual footprint:
    #   double-buffered x tile + double-buffered out tile
    #   + (conservatively double-buffered) resident weights/biases
    #   + 2x the f32 hidden intermediate as temporaries margin.
    in_isz = jnp.dtype(xp.dtype).itemsize
    w_isz = jnp.dtype(w1p.dtype).itemsize
    bytes_x_tile = block_b * d * in_isz
    bytes_o_tile = block_b * o_dim * 4
    bytes_h_tile = block_b * h_pad * 4
    bytes_weights = (d * h_pad + h_pad * o_dim) * w_isz + (h_pad + o_dim) * 4
    vmem_bytes = 2 * (bytes_x_tile + bytes_o_tile + bytes_weights) + 2 * bytes_h_tile
    vmem_bytes = int(max(vmem_bytes + (1 << 20), 2 << 20))

    grid = (n_pad // block_b,)
    out = pl.pallas_call(
        _mlp_kernel,
        out_shape=jax.ShapeDtypeStruct((n_pad, o_dim), jnp.float32),
        grid_spec=pl.GridSpec(
            grid=grid,
            in_specs=[
                pl.BlockSpec((block_b, d), lambda i: (i, 0)),    # x tile (streamed, unpadded D)
                pl.BlockSpec((d, h_pad), lambda i: (0, 0)),      # W1 (VMEM-resident)
                pl.BlockSpec((1, h_pad), lambda i: (0, 0)),      # b1
                pl.BlockSpec((h_pad, o_dim), lambda i: (0, 0)),  # W2 (VMEM-resident)
                pl.BlockSpec((1, o_dim), lambda i: (0, 0)),      # b2
            ],
            out_specs=pl.BlockSpec((block_b, o_dim), lambda i: (i, 0)),  # real O width
        ),
        compiler_params=pltpu.CompilerParams(
            dimension_semantics=("parallel",),  # batch axis shards across TCs (v7x)
            vmem_limit_bytes=vmem_bytes,
            allow_input_fusion=[True, False, False, False, False],  # fuse x pad/cast
        ),
    )(xp, w1p, b1p, w2p, b2p)

    # Only padded batch rows (if any) need slicing off; O is already exact width.
    return out if n_pad == n else out[:n]


def init_params(key, input_dim, hidden_layer_sizes=(100,), output_dim=1):
    """Deterministic init matching nn.Linear's default U(-1/sqrt(fan_in), 1/sqrt(fan_in)).

    Weights are stored (in, out) — transposed vs PyTorch — so the kernel computes
    x @ W + b directly.
    """
    params = []
    prev = input_dim
    dims = list(hidden_layer_sizes) + [output_dim]
    for size in dims:
        key, kw, kb = jax.random.split(key, 3)
        bound = 1.0 / jnp.sqrt(prev)
        w = jax.random.uniform(kw, (prev, size), jnp.float32, -bound, bound)
        b = jax.random.uniform(kb, (1, size), jnp.float32, -bound, bound)
        params.append((w, b))
        prev = size
    return params


def reference_forward(x, params):
    """Plain-JAX reference of the same MLP (for sanity checks)."""
    h = x
    for i, (w, b) in enumerate(params):
        h = h @ w + b
        if i < len(params) - 1:
            h = jnp.maximum(h, 0.0)
    return h


# TODO(synk): fit / predict / predict_proba (training loop, thresholding, sigmoid)
# are not part of forward() and are not implemented as Pallas kernels.

if __name__ == "__main__":
    key = jax.random.PRNGKey(0)

    # Small shapes consistent with the module: NeuralNetworkModel(input_dim=32,
    # hidden_layer_sizes=(64,), output_dim=1).
    batch, input_dim, hidden, output_dim = 8, 32, 64, 1

    key, kx = jax.random.split(key)
    x = jax.random.normal(kx, (batch, input_dim), jnp.float32)

    params = init_params(key, input_dim, hidden_layer_sizes=(hidden,), output_dim=output_dim)
    (w1, b1), (w2, b2) = params
    ref = reference_forward(x, params)

    # 1) f32 path: exact check against the pure-JAX reference.
    logits_f32 = jax.block_until_ready(mlp_forward(x, w1, b1, w2, b2, use_bf16=False))
    assert logits_f32.shape == (batch, output_dim)
    assert jnp.allclose(logits_f32, ref, atol=1e-5, rtol=1e-5), "f32 Pallas output mismatch"

    # 2) bf16-operand path (recommended on v6e/v7x): looser tolerance, f32 accumulation.
    #    Note: x itself is quantized to bf16, so the difference vs the f32 reference
    #    includes input-rounding error — expected.
    logits_bf16 = jax.block_until_ready(mlp_forward(x, w1, b1, w2, b2, use_bf16=True))
    assert logits_bf16.shape == (batch, output_dim)
    assert jnp.allclose(logits_bf16, ref, atol=5e-2, rtol=5e-2), "bf16 Pallas output mismatch"

    # 3) Larger, non-tile-multiple batch to exercise batch tiling + padding and the
    #    multi-step grid (>= 2 steps per TensorCore on v7x).
    key, kx2 = jax.random.split(key)
    x_big = jax.random.normal(kx2, (1000, input_dim), jnp.float32)
    ref_big = reference_forward(x_big, params)
    logits_big = jax.block_until_ready(mlp_forward(x_big, w1, b1, w2, b2, use_bf16=False))
    assert logits_big.shape == (1000, output_dim)
    assert jnp.allclose(logits_big, ref_big, atol=1e-5, rtol=1e-5), "tiled Pallas output mismatch"

    print("KERNEL_OK")
</pallas_src>

<mosaic_0001>
module attributes {stable_mosaic.version = 11 : i64} {
  func.func @_mlp_kernel(%arg0: i32, %arg1: memref<8x32xf32, #tpu.memory_space<vmem>>, %arg2: memref<32x128xf32, #tpu.memory_space<vmem>>, %arg3: memref<1x128xf32, #tpu.memory_space<vmem>>, %arg4: memref<128x1xf32, #tpu.memory_space<vmem>>, %arg5: memref<1x1xf32, #tpu.memory_space<vmem>>, %arg6: memref<8x1xf32, #tpu.memory_space<vmem>>) attributes {dimension_semantics = [#tpu.dimension_semantics<parallel>], iteration_bounds = array<i64: 1>, scalar_prefetch = 0 : i64, scratch_operands = 0 : i64, tpu.core_type = #tpu.core_type<tc>, window_params = [{transform_indices = @transform_0, window_bounds = array<i64: 8, 32>}, {pipeline_mode = #tpu.pipeline_mode<synchronous>, transform_indices = @transform_1, window_bounds = array<i64: 32, 128>}, {pipeline_mode = #tpu.pipeline_mode<synchronous>, transform_indices = @transform_2, window_bounds = array<i64: 1, 128>}, {pipeline_mode = #tpu.pipeline_mode<synchronous>, transform_indices = @transform_3, window_bounds = array<i64: 128, 1>}, {pipeline_mode = #tpu.pipeline_mode<synchronous>, transform_indices = @transform_4, window_bounds = array<i64: 1, 1>}, {transform_indices = @transform_5, window_bounds = array<i64: 8, 1>}]} {
    %c0 = arith.constant 0 : index
    %c0_0 = arith.constant 0 : index
    %0 = vector.load %arg1[%c0, %c0_0] : memref<8x32xf32, #tpu.memory_space<vmem>>, vector<8x32xf32>
    %c0_1 = arith.constant 0 : index
    %c0_2 = arith.constant 0 : index
    %1 = vector.load %arg2[%c0_1, %c0_2] : memref<32x128xf32, #tpu.memory_space<vmem>>, vector<32x128xf32>
    %cst = arith.constant dense<0.000000e+00> : vector<8x128xf32>
    %2 = tpu.matmul %0, %1, %cst {dimension_numbers = #tpu.dot_dimension_numbers<[1], [0], [0], [1], [0, 0, 1, 1], [], []>} : vector<8x32xf32>, vector<32x128xf32>, vector<8x128xf32> -> vector<8x128xf32>
    %c0_3 = arith.constant 0 : index
    %c0_4 = arith.constant 0 : index
    %3 = vector.load %arg3[%c0_3, %c0_4] : memref<1x128xf32, #tpu.memory_space<vmem>>, vector<1x128xf32>
    %4 = vector.broadcast %3 : vector<1x128xf32> to vector<8x128xf32>
    %5 = arith.addf %2, %4 : vector<8x128xf32>
    %cst_5 = arith.constant 0.000000e+00 : f32
    %6 = vector.broadcast %cst_5 : f32 to vector<8x128xf32>
    %7 = arith.maximumf %5, %6 : vector<8x128xf32>
    %c0_6 = arith.constant 0 : index
    %c0_7 = arith.constant 0 : index
    %8 = vector.load %arg4[%c0_6, %c0_7] : memref<128x1xf32, #tpu.memory_space<vmem>>, vector<128x1xf32>
    %cst_8 = arith.constant dense<0.000000e+00> : vector<8x1xf32>
    %9 = tpu.matmul %7, %8, %cst_8 {dimension_numbers = #tpu.dot_dimension_numbers<[1], [0], [0], [1], [0, 0, 1, 1], [], []>} : vector<8x128xf32>, vector<128x1xf32>, vector<8x1xf32> -> vector<8x1xf32>
    %c0_9 = arith.constant 0 : index
    %c0_10 = arith.constant 0 : index
    %10 = vector.load %arg5[%c0_9, %c0_10] : memref<1x1xf32, #tpu.memory_space<vmem>>, vector<1x1xf32>
    %11 = vector.broadcast %10 : vector<1x1xf32> to vector<8x1xf32>
    %12 = arith.addf %9, %11 : vector<8x1xf32>
    %c0_11 = arith.constant 0 : index
    %c0_12 = arith.constant 0 : index
    %13 = vector.load %arg6[%c0_11, %c0_12] : memref<8x1xf32, #tpu.memory_space<vmem>>, vector<8x1xf32>
    tpu.vector_store %arg6[%c0_11, %c0_12], %12 {strides = array<i32>} : memref<8x1xf32, #tpu.memory_space<vmem>>, vector<8x1xf32>,
    return
  }
  func.func @transform_0(%arg0: i32) -> (i32, i32) {
    %c0_i32 = arith.constant 0 : i32
    %c0_i32_0 = arith.constant 0 : i32
    return %arg0, %c0_i32 : i32, i32
  }
  func.func @transform_1(%arg0: i32) -> (i32, i32) {
    %c0_i32 = arith.constant 0 : i32
    %c0_i32_0 = arith.constant 0 : i32
    %c0_i32_1 = arith.constant 0 : i32
    return %c0_i32, %c0_i32_0 : i32, i32
  }
  func.func @transform_2(%arg0: i32) -> (i32, i32) {
    %c0_i32 = arith.constant 0 : i32
    %c0_i32_0 = arith.constant 0 : i32
    %c0_i32_1 = arith.constant 0 : i32
    return %c0_i32, %c0_i32_0 : i32, i32
  }
  func.func @transform_3(%arg0: i32) -> (i32, i32) {
    %c0_i32 = arith.constant 0 : i32
    %c0_i32_0 = arith.constant 0 : i32
    %c0_i32_1 = arith.constant 0 : i32
    return %c0_i32, %c0_i32_0 : i32, i32
  }
  func.func @transform_4(%arg0: i32) -> (i32, i32) {
    %c0_i32 = arith.constant 0 : i32
    %c0_i32_0 = arith.constant 0 : i32
    %c0_i32_1 = arith.constant 0 : i32
    return %c0_i32, %c0_i32_0 : i32, i32
  }
  func.func @transform_5(%arg0: i32) -> (i32, i32) {
    %c0_i32 = arith.constant 0 : i32
    %c0_i32_0 = arith.constant 0 : i32
    return %arg0, %c0_i32 : i32, i32
  }
}

</mosaic_0001>

<bundles_post_ra>
// kernel: mlp_forward.1
= control target key start
LH: loop header
LB: loop body
LE: loop exit
PB: predicated region body
PF: predicated region fallthrough
CT: control target
= control target key end

     0   :  { %v281_v0 = vmov 0.0   ;;  %vm282_vm0 = vmmov 0   ;;  %vm34_vm1 = vcmask 261120   ;;  %vm202_vm2 = vcmask 7168   ;;  %s409_s1 = inlined_call_operand.vmem [shape: f32[32,128], index: 1, kind: input, shape index: {}]   ;;  %s410_s3 = inlined_call_operand.vmem [shape: f32[128,1], index: 3, kind: input, shape index: {}]   ;;  %s411_s0 = inlined_call_operand.vmem [shape: f32[8,32], index: 0, kind: input, shape index: {}]   ;;  %s412_s4 = inlined_call_operand.<no memory space> [shape: f32[1,1], index: 4, kind: input, shape index: {}]   ;;  %s413_s2 = inlined_call_operand.vmem [shape: f32[1,128], index: 2, kind: input, shape index: {}]   ;;  %s414_s5 = inlined_call_operand.vmem [shape: f32[8,1], index: 5, kind: output, shape index: {}]  }
   0x1   :  { %233 = vmatprep.subr.mxu0 %v281_v0  ;;  %v26_v1 = vld [vmem:[%s409_s1 + $0x18] sm:$0xff]  ;;  %v25_v2 = vld [vmem:[%s409_s1 + $0x10] sm:$0xff]  ;;  %241 = vmatprep.mubr.msk.f32.mxu0 %vm282_vm0, %v281_v0  ;;  %v24_v4 = vld [vmem:[%s409_s1 + $0x8] sm:$0xff]  ;;  %v10_v22 = vstv %s412_s4 }
   0x2   :  { %234 = vmatpush3.msra.mxu0 %v26_v1  ;;  %244 = vmatprep.subr.mxu1 %v281_v0  ;;  %v124_v3 = vld [vmem:[%s410_s3 + $0x78] sm:$0xff]  ;;  %v123_v5 = vld [vmem:[%s410_s3 + $0x70] sm:$0xff]  ;;  %v122_v6 = vld [vmem:[%s410_s3 + $0x68] sm:$0xff]  ;;  %11 = vst [vmem:[#allocation2] sm:$0x1] %v10_v22 }
   0x3   :  { %235 = vmatprep.subr.mxu0 %v281_v0  ;;  %245 = vmatpush3.msra.mxu1 %v124_v3  ;;  %v23_v7 = vld [vmem:[%s409_s1] sm:$0xff]  ;;  %v120_v10 = vld [vmem:[%s410_s3 + $0x58] sm:$0xff]  ;;  %v119_v11 = vld [vmem:[%s410_s3 + $0x50] sm:$0xff] }
   0x4   :  { %236 = vmatpush3.msra.mxu0 %v25_v2  ;;  %246 = vmatprep.subr.mxu1 %v281_v0  ;;  %v22_v8 = vld [vmem:[%s411_s0] sm:$0xff]  ;;  %v118_v12 = vld [vmem:[%s410_s3 + $0x48] sm:$0xff]  ;;  %v116_v14 = vld [vmem:[%s410_s3 + $0x38] sm:$0xff] }
   0x5   :  { %237 = vmatprep.subr.mxu0 %v281_v0  ;;  %247 = vmatpush3.msra.mxu1 %v123_v5  ;;  %v121_v9 = vld [vmem:[%s410_s3 + $0x60] sm:$0xff]  ;;  %v115_v15 = vld [vmem:[%s410_s3 + $0x30] sm:$0xff]  ;;  %v114_v16 = vld [vmem:[%s410_s3 + $0x28] sm:$0xff] }
   0x6   :  { %238 = vmatpush3.msra.mxu0 %v24_v4  ;;  %248 = vmatprep.subr.mxu1 %v281_v0  ;;  %v117_v13 = vld [vmem:[%s410_s3 + $0x40] sm:$0xff]  ;;  %v112_v18 = vld [vmem:[%s410_s3 + $0x18] sm:$0xff]  ;;  %v111_v19 = vld [vmem:[%s410_s3 + $0x10] sm:$0xff] }
   0x7   :  { %239 = vmatprep.subr.mxu0 %v281_v0  ;;  %249 = vmatpush3.msra.mxu1 %v122_v6  ;;  %v113_v17 = vld [vmem:[%s410_s3 + $0x20] sm:$0xff]  ;;  %v110_v20 = vld [vmem:[%s410_s3 + $0x8] sm:$0xff] }
   0x8   :  { %240 = vmatpush3.msra.mxu0 %v23_v7  ;;  %250 = vmatprep.subr.mxu1 %v281_v0  ;;  %v109_v21 = vld [vmem:[%s410_s3] sm:$0xff] }
   0x9   :  { %242 = vmatmul.mubr.msk.f32.vlgmr.msra.gmra.mxu0 %vm34_vm1, %v22_v8  ;;  %251 = vmatpush3.msra.mxu1 %v121_v9  ;;  %v208_v23 = vld [vmem:[%s413_s2] ss:$0 sm:$0xff] }
   0xa   :  { %252 = vmatprep.subr.mxu1 %v281_v0  ;;  %276 = vmatprep.mubr.msk.f32.mxu1 %vm282_vm0, %v281_v0  ;;  %v210_v28 = vld [vmem:[#allocation2] ss:$0 sm:$0xff] }
   0xb   :  { %253 = vmatpush3.msra.mxu1 %v120_v10 }
   0xc   :  { %254 = vmatprep.subr.mxu1 %v281_v0 }
   0xd   :  { %255 = vmatpush3.msra.mxu1 %v119_v11 }
   0xe   :  { %256 = vmatprep.subr.mxu1 %v281_v0 }
   0xf   :  { %257 = vmatpush3.msra.mxu1 %v118_v12 }
  0x10   :  { %258 = vmatprep.subr.mxu1 %v281_v0 }
  0x11   :  { %259 = vmatpush3.msra.mxu1 %v117_v13 }
  0x12   :  { %260 = vmatprep.subr.mxu1 %v281_v0 }
  0x13   :  { %261 = vmatpush3.msra.mxu1 %v116_v14 }
  0x14   :  { %262 = vmatprep.subr.mxu1 %v281_v0 }
  0x15   :  { %263 = vmatpush3.msra.mxu1 %v115_v15 }
  0x16   :  { %264 = vmatprep.subr.mxu1 %v281_v0 }
  0x17   :  { %265 = vmatpush3.msra.mxu1 %v114_v16 }
  0x18   :  { %266 = vmatprep.subr.mxu1 %v281_v0 }
  0x19   :  { %267 = vmatpush3.msra.mxu1 %v113_v17 }
  0x1a   :  { %268 = vmatprep.subr.mxu1 %v281_v0 }
  0x1b   :  { %269 = vmatpush3.msra.mxu1 %v112_v18 }
  0x1c   :  { %270 = vmatprep.subr.mxu1 %v281_v0 }
  0x1d   :  { %271 = vmatpush3.msra.mxu1 %v111_v19 }
  0x1e   :  { %272 = vmatprep.subr.mxu1 %v281_v0 }
  0x1f   :  { %273 = vmatpush3.msra.mxu1 %v110_v20 }
  0x20   :  { %274 = vmatprep.subr.mxu1 %v281_v0 }
  0x21   :  { %275 = vmatpush3.msra.mxu1 %v109_v21 }
  0xc9   :  { %v104_v24 = vpop.f32.mrf.mxu0 }
  0xca   :  { %v105_v25 = vadd.f32 %v208_v23, %v104_v24 }
  0xcb   :  { %v243_v26 = vpop.f32.mrf.mxu0 }
  0xcc   :  { %v108_v27 = vmax.f32 %v105_v25, 0.0 }
  0xce   :  { %277 = vmatmul.mubr.f32.vlgmr.msra.gmra.mxu1 %v108_v27 }
 0x18e   :  { %v198_v29 = vpop.f32.mrf.mxu1 }
 0x18f   :  { %v199_v30 = vadd.f32 %v210_v28, %v198_v29 }
 0x190   :  { %v278_v31 = vpop.f32.mrf.mxu1 }
 0x191   :  { %203 = vst.msk [vmem:[%s414_s5] sm:$0xff] %vm202_vm2, %v199_v30 }

</bundles_post_ra>
